<compile_context>
chip_gen: v7x
topology: tpu7x:2x2x1
jax: 0.10.0
libtpu: 0.0.40
codegen_flags: <defaults>
</compile_context>

<pallas_src>
import math

import jax
import jax.numpy as jnp
from jax import lax
from jax.experimental import pallas as pl
from jax.experimental.pallas import tpu as pltpu

_INV_SQRT2 = 0.7071067811865476
_LANE = 128


def _round_up(x, m):
    return ((x + m - 1) // m) * m


def _vmem_capacity_bytes():
    try:
        return int(pltpu.get_tpu_info().vmem_capacity_bytes)
    except Exception:
        return 64 * 1024 * 1024  # v7x-safe fallback


# ----------------------------------------------------------------------------
# Pallas kernel: shifted-slice conv (no im2col) + bias + exact GELU, fused.
# ----------------------------------------------------------------------------
def _make_conv_gelu_kernel(tap_offsets, halo_width):
    """tap_offsets: static flattened-spatial offsets (one per (kh, kw) tap).
    halo_width:    static, 128-aligned number of halo lanes taken from the
                   next spatial tile (>= largest tap offset)."""

    def kernel(x_ref, xh_ref, w_ref, b_ref, o_ref):
        # x_ref : (C, TM)     current lane tile of the flattened padded image
        # xh_ref: (C, TM)     next lane tile (halo source; clamped at the end)
        # w_ref : (T, OC, C)  per-tap weight matrices   (grid-invariant, VMEM)
        # b_ref : (OC, 1)     bias column               (grid-invariant, VMEM)
        # o_ref : (OC, TM)    lane-dense output tile
        tm = o_ref.shape[-1]
        x_main = x_ref[...]
        if halo_width > 0:
            # 128-aligned concat: offset TM and halo_width are lane-aligned.
            xt = jnp.concatenate([x_main, xh_ref[:, :halo_width]], axis=-1)
        else:
            xt = x_main
        acc = jnp.zeros(o_ref.shape, jnp.float32)
        for t, d in enumerate(tap_offsets):         # static KH*KW-step loop
            acc = acc + jnp.dot(w_ref[t], xt[:, d:d + tm],
                                preferred_element_type=jnp.float32)   # MXU
        acc = acc + b_ref[...]                      # lane broadcast (minor)
        # Exact GELU (PyTorch nn.GELU default): 0.5 * x * (1 + erf(x/sqrt(2)))
        o_ref[...] = (0.5 * acc *
                      (1.0 + lax.erf(acc * jnp.float32(_INV_SQRT2)))
                      ).astype(o_ref.dtype)

    return kernel


# ----------------------------------------------------------------------------
# Wrapper reproducing ConvWithNonLinearity.forward (NCHW in, NCHW out)
# ----------------------------------------------------------------------------
def conv_with_nonlinearity(x, weight, bias, *, stride: int, padding: int):
    """x: (N, C, H, W) f32; weight: (OC, C, KH, KW); bias: (OC,)."""
    N, C, H, W = x.shape
    OC, _, KH, KW = weight.shape
    Hp, Wp = H + 2 * padding, W + 2 * padding
    OH = (Hp - KH) // stride + 1
    OW = (Wp - KW) // stride + 1
    T = KH * KW
    Mp = Hp * Wp                        # flattened padded spatial extent
    d_max = (KH - 1) * Wp + (KW - 1)    # largest (stride-1) tap offset

    # ---- VMEM-aware tiling (generation aware: 128 MiB v5e/v6e, 64 MiB v7x) --
    vmem_cap = _vmem_capacity_bytes()
    vmem_limit = int(min(100 * 2 ** 20, 0.75 * vmem_cap))
    halo = _round_up(d_max, _LANE) if d_max > 0 else 0
    fixed = 4 * (2 * T * OC * C + 2 * OC)              # resident weights/bias
    per_tm = 4 * (2 * C + 2 * C + 2 * OC)              # dbl-buffered x, halo, out
    budget = max(vmem_limit - fixed - (4 << 20), per_tm * _LANE)
    tm_cap = max(_LANE, (budget // per_tm) // _LANE * _LANE)
    tm_cap = min(tm_cap, 4096)                         # diminishing returns past 4k
    TM = min(_round_up(Mp, _LANE), tm_cap)
    TM = max(TM, _LANE, halo)                          # halo must fit one tile
    tpi = -(-Mp // TM)                                 # spatial tiles per image
    Lseg = tpi * TM

    # ---- glue: pad + flatten input (NO im2col duplication); reorder weights -
    x_pad = jnp.pad(x, ((0, 0), (0, 0), (padding, padding), (padding, padding)))
    x_flat = x_pad.reshape(N, C, Mp)
    if Lseg != Mp:
        x_flat = jnp.pad(x_flat, ((0, 0), (0, 0), (0, Lseg - Mp)))
    w_taps = weight.transpose(2, 3, 0, 1).reshape(T, OC, C).astype(jnp.float32)
    b_col = bias.reshape(OC, 1).astype(jnp.float32)
    # Tap t = kh*KW + kw reads flattened offset kh*Wp + kw (matches w_taps).
    tap_offsets = tuple(kh * Wp + kw for kh in range(KH) for kw in range(KW))

    cost = pl.CostEstimate(
        flops=2 * N * Lseg * OC * C * T,
        transcendentals=0,  # erf lowers to a VALU polynomial, not an EUP op
        bytes_accessed=4 * (2 * N * C * Lseg + T * OC * C + OC + N * OC * Lseg),
    )

    kernel = _make_conv_gelu_kernel(tap_offsets, halo)

    y_flat = pl.pallas_call(
        kernel,
        out_shape=jax.ShapeDtypeStruct((N, OC, Lseg), jnp.float32),
        grid_spec=pltpu.PrefetchScalarGridSpec(
            num_scalar_prefetch=0,
            grid=(N, tpi),
            in_specs=[
                # current spatial tile of this image
                pl.BlockSpec((None, C, TM), lambda n, t: (n, 0, t)),
                # next spatial tile (halo); clamped — last tile never uses it
                # for valid output positions.
                pl.BlockSpec((None, C, TM),
                             lambda n, t: (n, 0, jnp.minimum(t + 1, tpi - 1))),
                # grid-invariant weights / bias: stay resident in VMEM
                pl.BlockSpec((T, OC, C), lambda n, t: (0, 0, 0)),
                pl.BlockSpec((OC, 1), lambda n, t: (0, 0)),
            ],
            out_specs=pl.BlockSpec((None, OC, TM), lambda n, t: (n, 0, t)),
        ),
        compiler_params=pltpu.CompilerParams(
            dimension_semantics=("parallel", "parallel"),
            vmem_limit_bytes=vmem_limit,
        ),
        cost_estimate=cost,
    )(x_flat, x_flat, w_taps, b_col)

    # The kernel computes a stride-1 conv over the full padded grid; extract
    # the valid (strided) output positions.  (stride>1 over-computes a bit;
    # acceptable glue — stride=1 is the common case.)
    y = y_flat[:, :, :Mp].reshape(N, OC, Hp, Wp)
    return y[:, :, ::stride, ::stride][:, :, :OH, :OW]


# ----------------------------------------------------------------------------
# Pure-JAX reference (for correctness check)
# ----------------------------------------------------------------------------
def _reference(x, weight, bias, *, stride: int, padding: int):
    y = lax.conv_general_dilated(
        x, weight,
        window_strides=(stride, stride),
        padding=[(padding, padding), (padding, padding)],
        dimension_numbers=("NCHW", "OIHW", "NCHW"),
        precision=lax.Precision.HIGHEST,
    )
    y = y + bias.reshape(1, -1, 1, 1)
    return 0.5 * y * (1.0 + lax.erf(y * jnp.float32(_INV_SQRT2)))


if __name__ == "__main__":
    # Module config (small, consistent with the forward pass)
    in_ch, out_ch, ksize, stride, padding = 4, 8, 3, 1, 1
    N, H, W = 2, 16, 16

    key = jax.random.PRNGKey(0)
    kx, kw_, kb = jax.random.split(key, 3)

    # Deterministic parameter init (PyTorch Conv2d-style uniform bounds)
    fan_in = in_ch * ksize * ksize
    bound = 1.0 / math.sqrt(fan_in)
    weight = jax.random.uniform(kw_, (out_ch, in_ch, ksize, ksize),
                                jnp.float32, -bound, bound)
    bias = jax.random.uniform(kb, (out_ch,), jnp.float32, -bound, bound)

    x = jax.random.normal(kx, (N, in_ch, H, W), jnp.float32)

    out = jax.block_until_ready(
        conv_with_nonlinearity(x, weight, bias, stride=stride, padding=padding))
    ref = jax.block_until_ready(
        _reference(x, weight, bias, stride=stride, padding=padding))

    assert out.shape == ref.shape, (out.shape, ref.shape)
    max_err = float(jnp.max(jnp.abs(out - ref)))
    assert jnp.allclose(out, ref, atol=1e-4, rtol=1e-4), max_err

    print("KERNEL_OK")
</pallas_src>

<mosaic_0001>
module attributes {stable_mosaic.version = 11 : i64} {
  func.func @kernel(%arg0: i32, %arg1: i32, %arg2: memref<1x4x384xf32, #tpu.memory_space<vmem>>, %arg3: memref<1x4x384xf32, #tpu.memory_space<vmem>>, %arg4: memref<9x8x4xf32, #tpu.memory_space<vmem>>, %arg5: memref<8x1xf32, #tpu.memory_space<vmem>>, %arg6: memref<1x8x384xf32, #tpu.memory_space<vmem>>) attributes {dimension_semantics = [#tpu.dimension_semantics<parallel>, #tpu.dimension_semantics<parallel>], iteration_bounds = array<i64: 2, 1>, scalar_prefetch = 0 : i64, scratch_operands = 0 : i64, tpu.core_type = #tpu.core_type<tc>, window_params = [{transform_indices = @transform_0, window_bounds = array<i64: 1, 4, 384>}, {transform_indices = @transform_1, window_bounds = array<i64: 1, 4, 384>}, {pipeline_mode = #tpu.pipeline_mode<synchronous>, transform_indices = @transform_2, window_bounds = array<i64: 9, 8, 4>}, {pipeline_mode = #tpu.pipeline_mode<synchronous>, transform_indices = @transform_3, window_bounds = array<i64: 8, 1>}, {transform_indices = @transform_4, window_bounds = array<i64: 1, 8, 384>}]} {
    %c0 = arith.constant 0 : index
    %c0_0 = arith.constant 0 : index
    %c0_1 = arith.constant 0 : index
    %0 = vector.load %arg2[%c0, %c0_0, %c0_1] : memref<1x4x384xf32, #tpu.memory_space<vmem>>, vector<1x4x384xf32>
    %1 = vector.shape_cast %0 : vector<1x4x384xf32> to vector<4x384xf32>
    %c0_2 = arith.constant 0 : index
    %c0_3 = arith.constant 0 : index
    %c0_4 = arith.constant 0 : index
    %2 = vector.load %arg3[%c0_2, %c0_3, %c0_4] : memref<1x4x384xf32, #tpu.memory_space<vmem>>, vector<1x4x128xf32>
    %3 = vector.shape_cast %2 : vector<1x4x128xf32> to vector<4x128xf32>
    %4 = tpu.concatenate %1, %3 in 1 : vector<4x384xf32>, vector<4x128xf32> -> vector<4x512xf32>
    %cst = arith.constant 0.000000e+00 : f32
    %5 = vector.broadcast %cst : f32 to vector<8x384xf32>
    %c0_5 = arith.constant 0 : index
    %c0_6 = arith.constant 0 : index
    %c0_7 = arith.constant 0 : index
    %6 = vector.load %arg4[%c0_5, %c0_6, %c0_7] : memref<9x8x4xf32, #tpu.memory_space<vmem>>, vector<1x8x4xf32>
    %7 = vector.shape_cast %6 : vector<1x8x4xf32> to vector<8x4xf32>
    %8 = vector.extract_strided_slice %4 {offsets = [0, 0], sizes = [4, 384], strides = [1, 1]} : vector<4x512xf32> to vector<4x384xf32>
    %cst_8 = arith.constant dense<0.000000e+00> : vector<8x384xf32>
    %9 = tpu.matmul %7, %8, %cst_8 {dimension_numbers = #tpu.dot_dimension_numbers<[1], [0], [0], [1], [0, 0, 1, 1], [], []>} : vector<8x4xf32>, vector<4x384xf32>, vector<8x384xf32> -> vector<8x384xf32>
    %10 = arith.addf %5, %9 : vector<8x384xf32>
    %c1 = arith.constant 1 : index
    %c0_9 = arith.constant 0 : index
    %c0_10 = arith.constant 0 : index
    %11 = vector.load %arg4[%c1, %c0_9, %c0_10] : memref<9x8x4xf32, #tpu.memory_space<vmem>>, vector<1x8x4xf32>
    %12 = vector.shape_cast %11 : vector<1x8x4xf32> to vector<8x4xf32>
    %13 = vector.extract_strided_slice %4 {offsets = [0, 1], sizes = [4, 384], strides = [1, 1]} : vector<4x512xf32> to vector<4x384xf32>
    %cst_11 = arith.constant dense<0.000000e+00> : vector<8x384xf32>
    %14 = tpu.matmul %12, %13, %cst_11 {dimension_numbers = #tpu.dot_dimension_numbers<[1], [0], [0], [1], [0, 0, 1, 1], [], []>} : vector<8x4xf32>, vector<4x384xf32>, vector<8x384xf32> -> vector<8x384xf32>
    %15 = arith.addf %10, %14 : vector<8x384xf32>
    %c2 = arith.constant 2 : index
    %c0_12 = arith.constant 0 : index
    %c0_13 = arith.constant 0 : index
    %16 = vector.load %arg4[%c2, %c0_12, %c0_13] : memref<9x8x4xf32, #tpu.memory_space<vmem>>, vector<1x8x4xf32>
    %17 = vector.shape_cast %16 : vector<1x8x4xf32> to vector<8x4xf32>
    %18 = vector.extract_strided_slice %4 {offsets = [0, 2], sizes = [4, 384], strides = [1, 1]} : vector<4x512xf32> to vector<4x384xf32>
    %cst_14 = arith.constant dense<0.000000e+00> : vector<8x384xf32>
    %19 = tpu.matmul %17, %18, %cst_14 {dimension_numbers = #tpu.dot_dimension_numbers<[1], [0], [0], [1], [0, 0, 1, 1], [], []>} : vector<8x4xf32>, vector<4x384xf32>, vector<8x384xf32> -> vector<8x384xf32>
    %20 = arith.addf %15, %19 : vector<8x384xf32>
    %c3 = arith.constant 3 : index
    %c0_15 = arith.constant 0 : index
    %c0_16 = arith.constant 0 : index
    %21 = vector.load %arg4[%c3, %c0_15, %c0_16] : memref<9x8x4xf32, #tpu.memory_space<vmem>>, vector<1x8x4xf32>
    %22 = vector.shape_cast %21 : vector<1x8x4xf32> to vector<8x4xf32>
    %23 = vector.extract_strided_slice %4 {offsets = [0, 18], sizes = [4, 384], strides = [1, 1]} : vector<4x512xf32> to vector<4x384xf32>
    %cst_17 = arith.constant dense<0.000000e+00> : vector<8x384xf32>
    %24 = tpu.matmul %22, %23, %cst_17 {dimension_numbers = #tpu.dot_dimension_numbers<[1], [0], [0], [1], [0, 0, 1, 1], [], []>} : vector<8x4xf32>, vector<4x384xf32>, vector<8x384xf32> -> vector<8x384xf32>
    %25 = arith.addf %20, %24 : vector<8x384xf32>
    %c4 = arith.constant 4 : index
    %c0_18 = arith.constant 0 : index
    %c0_19 = arith.constant 0 : index
    %26 = vector.load %arg4[%c4, %c0_18, %c0_19] : memref<9x8x4xf32, #tpu.memory_space<vmem>>, vector<1x8x4xf32>
    %27 = vector.shape_cast %26 : vector<1x8x4xf32> to vector<8x4xf32>
    %28 = vector.extract_strided_slice %4 {offsets = [0, 19], sizes = [4, 384], strides = [1, 1]} : vector<4x512xf32> to vector<4x384xf32>
    %cst_20 = arith.constant dense<0.000000e+00> : vector<8x384xf32>
    %29 = tpu.matmul %27, %28, %cst_20 {dimension_numbers = #tpu.dot_dimension_numbers<[1], [0], [0], [1], [0, 0, 1, 1], [], []>} : vector<8x4xf32>, vector<4x384xf32>, vector<8x384xf32> -> vector<8x384xf32>
    %30 = arith.addf %25, %29 : vector<8x384xf32>
    %c5 = arith.constant 5 : index
    %c0_21 = arith.constant 0 : index
    %c0_22 = arith.constant 0 : index
    %31 = vector.load %arg4[%c5, %c0_21, %c0_22] : memref<9x8x4xf32, #tpu.memory_space<vmem>>, vector<1x8x4xf32>
    %32 = vector.shape_cast %31 : vector<1x8x4xf32> to vector<8x4xf32>
    %33 = vector.extract_strided_slice %4 {offsets = [0, 20], sizes = [4, 384], strides = [1, 1]} : vector<4x512xf32> to vector<4x384xf32>
    %cst_23 = arith.constant dense<0.000000e+00> : vector<8x384xf32>
    %34 = tpu.matmul %32, %33, %cst_23 {dimension_numbers = #tpu.dot_dimension_numbers<[1], [0], [0], [1], [0, 0, 1, 1], [], []>} : vector<8x4xf32>, vector<4x384xf32>, vector<8x384xf32> -> vector<8x384xf32>
    %35 = arith.addf %30, %34 : vector<8x384xf32>
    %c6 = arith.constant 6 : index
    %c0_24 = arith.constant 0 : index
    %c0_25 = arith.constant 0 : index
    %36 = vector.load %arg4[%c6, %c0_24, %c0_25] : memref<9x8x4xf32, #tpu.memory_space<vmem>>, vector<1x8x4xf32>
    %37 = vector.shape_cast %36 : vector<1x8x4xf32> to vector<8x4xf32>
    %38 = vector.extract_strided_slice %4 {offsets = [0, 36], sizes = [4, 384], strides = [1, 1]} : vector<4x512xf32> to vector<4x384xf32>
    %cst_26 = arith.constant dense<0.000000e+00> : vector<8x384xf32>
    %39 = tpu.matmul %37, %38, %cst_26 {dimension_numbers = #tpu.dot_dimension_numbers<[1], [0], [0], [1], [0, 0, 1, 1], [], []>} : vector<8x4xf32>, vector<4x384xf32>, vector<8x384xf32> -> vector<8x384xf32>
    %40 = arith.addf %35, %39 : vector<8x384xf32>
    %c7 = arith.constant 7 : index
    %c0_27 = arith.constant 0 : index
    %c0_28 = arith.constant 0 : index
    %41 = vector.load %arg4[%c7, %c0_27, %c0_28] : memref<9x8x4xf32, #tpu.memory_space<vmem>>, vector<1x8x4xf32>
    %42 = vector.shape_cast %41 : vector<1x8x4xf32> to vector<8x4xf32>
    %43 = vector.extract_strided_slice %4 {offsets = [0, 37], sizes = [4, 384], strides = [1, 1]} : vector<4x512xf32> to vector<4x384xf32>
    %cst_29 = arith.constant dense<0.000000e+00> : vector<8x384xf32>
    %44 = tpu.matmul %42, %43, %cst_29 {dimension_numbers = #tpu.dot_dimension_numbers<[1], [0], [0], [1], [0, 0, 1, 1], [], []>} : vector<8x4xf32>, vector<4x384xf32>, vector<8x384xf32> -> vector<8x384xf32>
    %45 = arith.addf %40, %44 : vector<8x384xf32>
    %c8 = arith.constant 8 : index
    %c0_30 = arith.constant 0 : index
    %c0_31 = arith.constant 0 : index
    %46 = vector.load %arg4[%c8, %c0_30, %c0_31] : memref<9x8x4xf32, #tpu.memory_space<vmem>>, vector<1x8x4xf32>
    %47 = vector.shape_cast %46 : vector<1x8x4xf32> to vector<8x4xf32>
    %48 = vector.extract_strided_slice %4 {offsets = [0, 38], sizes = [4, 384], strides = [1, 1]} : vector<4x512xf32> to vector<4x384xf32>
    %cst_32 = arith.constant dense<0.000000e+00> : vector<8x384xf32>
    %49 = tpu.matmul %47, %48, %cst_32 {dimension_numbers = #tpu.dot_dimension_numbers<[1], [0], [0], [1], [0, 0, 1, 1], [], []>} : vector<8x4xf32>, vector<4x384xf32>, vector<8x384xf32> -> vector<8x384xf32>
    %50 = arith.addf %45, %49 : vector<8x384xf32>
    %c0_33 = arith.constant 0 : index
    %c0_34 = arith.constant 0 : index
    %51 = vector.load %arg5[%c0_33, %c0_34] : memref<8x1xf32, #tpu.memory_space<vmem>>, vector<8x1xf32>
    %52 = vector.broadcast %51 : vector<8x1xf32> to vector<8x384xf32>
    %53 = arith.addf %50, %52 : vector<8x384xf32>
    %cst_35 = arith.constant 5.000000e-01 : f32
    %54 = vector.broadcast %cst_35 : f32 to vector<8x384xf32>
    %55 = arith.mulf %54, %53 : vector<8x384xf32>
    %cst_36 = arith.constant 0.707106769 : f32
    %56 = vector.broadcast %cst_36 : f32 to vector<8x384xf32>
    %57 = arith.mulf %53, %56 : vector<8x384xf32>
    %58 = math.erf %57 : vector<8x384xf32>
    %cst_37 = arith.constant 1.000000e+00 : f32
    %59 = vector.broadcast %cst_37 : f32 to vector<8x384xf32>
    %60 = arith.addf %59, %58 : vector<8x384xf32>
    %61 = arith.mulf %55, %60 : vector<8x384xf32>
    %c0_38 = arith.constant 0 : index
    %c0_39 = arith.constant 0 : index
    %c0_40 = arith.constant 0 : index
    %62 = vector.load %arg6[%c0_38, %c0_39, %c0_40] : memref<1x8x384xf32, #tpu.memory_space<vmem>>, vector<1x8x384xf32>
    %63 = vector.shape_cast %62 : vector<1x8x384xf32> to vector<8x384xf32>
    %64 = vector.shape_cast %61 : vector<8x384xf32> to vector<1x8x384xf32>
    tpu.vector_store %arg6[%c0_38, %c0_39, %c0_40], %64 {strides = array<i32>} : memref<1x8x384xf32, #tpu.memory_space<vmem>>, vector<1x8x384xf32>,
    return
  }
  func.func @transform_0(%arg0: i32, %arg1: i32) -> (i32, i32, i32) {
    %c0_i32 = arith.constant 0 : i32
    %c0_i32_0 = arith.constant 0 : i32
    return %arg0, %c0_i32, %arg1 : i32, i32, i32
  }
  func.func @transform_1(%arg0: i32, %arg1: i32) -> (i32, i32, i32) {
    %c1_i32 = arith.constant 1 : i32
    %0 = arith.addi %arg1, %c1_i32 : i32
    %c0_i32 = arith.constant 0 : i32
    %1 = arith.minsi %0, %c0_i32 : i32
    %c0_i32_0 = arith.constant 0 : i32
    %c0_i32_1 = arith.constant 0 : i32
    return %arg0, %c0_i32_0, %1 : i32, i32, i32
  }
  func.func @transform_2(%arg0: i32, %arg1: i32) -> (i32, i32, i32) {
    %c0_i32 = arith.constant 0 : i32
    %c0_i32_0 = arith.constant 0 : i32
    %c0_i32_1 = arith.constant 0 : i32
    %c0_i32_2 = arith.constant 0 : i32
    return %c0_i32, %c0_i32_0, %c0_i32_1 : i32, i32, i32
  }
  func.func @transform_3(%arg0: i32, %arg1: i32) -> (i32, i32) {
    %c0_i32 = arith.constant 0 : i32
    %c0_i32_0 = arith.constant 0 : i32
    %c0_i32_1 = arith.constant 0 : i32
    return %c0_i32, %c0_i32_0 : i32, i32
  }
  func.func @transform_4(%arg0: i32, %arg1: i32) -> (i32, i32, i32) {
    %c0_i32 = arith.constant 0 : i32
    %c0_i32_0 = arith.constant 0 : i32
    return %arg0, %c0_i32, %arg1 : i32, i32, i32
  }
}

</mosaic_0001>

<bundles_post_ra>
// kernel: tpu_custom_call.1
= control target key start
LH: loop header
LB: loop body
LE: loop exit
PB: predicated region body
PF: predicated region fallthrough
CT: control target
= control target key end

     0   :  { %9 = vsyncpa [#allocation3], 0  ;;  %s2533_s0 = inlined_call_operand.vmem [shape: f32[2,4,384], index: 0, kind: input, shape index: {}]   ;;  %s2534_s1 = inlined_call_operand.vmem [shape: f32[2,4,384], index: 1, kind: input, shape index: {}]   ;;  %s2535_s2 = inlined_call_operand.vmem [shape: f32[9,8,4], index: 2, kind: input, shape index: {}]   ;;  %s2536_s3 = inlined_call_operand.vmem [shape: f32[8,1], index: 3, kind: input, shape index: {}]   ;;  %s2537_s4 = inlined_call_operand.hbm [shape: f32[2,8,384], index: 4, kind: output, shape index: {}]  }
   0x1   :  { %11 = vsyncpa [#allocation3 + $0x1], 0  ;;  %s2251_s15 = smov 0   ;;  %s2253_s16 = smov 0  }
   0x2   :  { %s2255_s17 = smov 0   ;;  %s2257_s18 = smov 0  }
   0x3   :  { %s2259_s19 = smov 0   ;;  %s2261_s20 = smov 0  }
   0x4 LB: > { %s1915_s21 = sadd.s32 4294967295, %s2212_s20   ;;  %s1916_s22 = sadd.s32 4294967294, %s2212_s20   ;;  %s2212_s20 = sphi %s2261_s20, %s17_s20   ;;  %s2208_s19 = sphi %s2259_s19, %s2544_s19   ;;  %s2204_s18 = sphi %s2257_s18, %s2543_s18   ;;  %s2200_s17 = sphi %s2255_s17, %s2542_s17   ;;  %s2196_s16 = sphi %s2253_s16, %s2541_s16   ;;  %s2192_s15 = sphi %s2251_s15, %s2540_s15  }
   0x5   : > { %s29_s23 = sadd.s32 1, %s2208_s19  ;;  %s142_s24 = sadd.s32 1, %s2200_s17 }
   0x6   : > { %p31_p0 = scmp.ge.s32.totalorder %s29_s23, 2  ;;  %p152_p1 = scmp.ne.s32.totalorder %s2200_s17, %s2196_s16 }
   0x7   : > { %p153_p2 = scmp.eq.s32.totalorder %s1915_s21, 1  ;;  %p158_p3 = scmp.ne.s32.totalorder %s2196_s16, %s2192_s15 }
   0x8   : > { %s2546_s23 = smov (%p31_p0, %s29_s23), 0  ;;  %p159_p5 = scmp.eq.s32.totalorder %s1916_s22, 1 }
   0x9   : > { %p2291_p4 = por %p153_p2, %p152_p1  ;;  %s137_s26 = ssub.s32 %s2208_s19, %s2546_s23 }
   0xa   : > { %p1919_p6 = scmp.ge.s32.totalorder %s2212_s20, 1  ;;  %p140_p7 = scmp.eq.s32.totalorder %s137_s26, 0 }
   0xb   : > { %p2298_p8 = por %p159_p5, %p158_p3  ;;  %p215_p9 = scmp.lt.s32.totalorder %s2212_s20, 3 }
   0xc   : > { %s2304_s28 = scalar_select %p140_p7, %s2200_s17, %s142_s24  }
   0xd   : > { %p216_p10 = pnand %p1919_p6, %p215_p9 }
   0xe   : > { %p258_p11 = scmp.lt.s32.totalorder (!%p216_p10), %s2204_s18, 1  ;;  %v2214_v0 = vmov (!%p216_p10), 0.0   ;;  %s2215_s8 = smov (!%p216_p10), 127   ;;  %vm2217_vm0 = vmmov (!%p216_p10), 0   ;;  %v2224_v5 = vmov (!%p216_p10), 0   ;;  %v1777_v6 = vld [vmem:[%s2536_s3] sm:$0xff] (!%p216_p10) }
   0xf   : > { %219 = sbr.rel (%p216_p10) target bundleno = 462 (0x1ce), region = 36  ;;  %381 = vmatprep.mubr.f32.mxu0 (!%p216_p10), %v2214_v0  ;;  %1996 = vmatprep.subr.mxu1 (!%p216_p10), %v2214_v0  ;;  %s2216_s9 = smov (!%p216_p10), 126   ;;  %vm302_vm1 = vcmask (!%p216_p10), 1039360   ;;  %vm310_vm2 = vcmask (!%p216_p10), 1043456   ;;  %v1922_v12 = vld [vmem:[%s2535_s2 + $0x8] sm:$0xff] (!%p216_p10)  ;;  %vm306_vm3 = vcmask (!%p216_p10), 31744  }
  0x10   : > { %1998 = vmatprep.mubr.msk.f32.mxu1 (!%p216_p10), %vm2217_vm0, %v2214_v0  ;;  %s2218_s13 = smov (!%p216_p10), 110   ;;  %s2219_s14 = smov (!%p216_p10), 109   ;;  %2126 = vset.pattern.permute.xlu0 (!%p216_p10), %v2224_v5  ;;  %vm618_vm4 = vcmask (!%p216_p10), 1031168   ;;  %vm785_vm5 = vcmask (!%p216_p10), 900096   ;;  %v290_v19 = vld [vmem:[%s2535_s2] sm:$0xff] (!%p216_p10)  ;;  %vm952_vm6 = vcmask (!%p216_p10), 891904  }
  0x11   : > { %s2220_s21 = smov (!%p216_p10), 108   ;;  %s2221_s22 = smov (!%p216_p10), 92   ;;  %v1933_v27 = vld [vmem:[%s2535_s2 + $0x10] sm:$0xff] (!%p216_p10)  ;;  %vm1119_vm7 = vcmask (!%p216_p10), 883712   ;;  %v1939_v35 = vld [vmem:[%s2535_s2 + $0x18] sm:$0xff] (!%p216_p10)  ;;  %v1945_v44 = vld [vmem:[%s2535_s2 + $0x20] sm:$0xff] (!%p216_p10) }
  0x12   : > { %s2222_s24 = smov (!%p216_p10), 91   ;;  %s2223_s26 = smov (!%p216_p10), 90   ;;  %vm1286_vm8 = vcmask (!%p216_p10), 752640   ;;  %v1951_v51 = vld [vmem:[%s2535_s2 + $0x28] sm:$0xff] (!%p216_p10)  ;;  %vm1453_vm9 = vcmask (!%p216_p10), 744448   ;;  %v1957_v57 = vld [vmem:[%s2535_s2 + $0x30] sm:$0xff] (!%p216_p10) }
  0x13   : > { %v1963_v62 = vld [vmem:[%s2535_s2 + $0x38] sm:$0xff] (!%p216_p10)  ;;  %vm1620_vm10 = vcmask (!%p216_p10), 736256   ;;  %s2059_s10 = smul.u32 (!%p216_p10), 384, %s2204_s18 }
  0x16   : > { %s259_s29 = scalar_select %p258_p11, %s2204_s18, 1 }
  0x18   : > { %s2058_s30 = smul.u32 12, %s259_s29 }
  0x1a   : > { %s265_s7 = scalar_lea.vmem %s2533_s0, %s2058_s30  ;;  %s278_s12 = scalar_lea.vmem %s2534_s1, %s2058_s30 }
  0x1b   : > { %v2313_v1 = vld [vmem:[%s265_s7] sm:$0xff]  ;;  %v2321_v3 = vld [vmem:[%s265_s7 + $0x8] sm:$0xf]  ;;  %s254_s7 = sand.u32 1, %s2196_s16  }
  0x1c   : > { %294 = vrot.lane.b32.xlu1 %v2313_v1, %s2215_s8  ;;  %v2318_v2 = vcombine.high %v2313_v1, %v2313_v1  ;;  %v286_v4 = vld [vmem:[%s278_s12] sm:$0xf]  ;;  %s1805_s18 = scalar_lea.sflag [#allocation3], %s254_s7 }
  0x1e   : > { %296 = vrot.lane.b32.xlu0 %v2318_v2, %s2215_s8 }
  0x20   : > { %610 = vrot.lane.b32.xlu1 %v2313_v1, %s2216_s9 }
  0x22   : > { %298 = vrot.lane.b32.xlu0 %v2321_v3, %s2215_s8 }
  0x24   : > { %612 = vrot.lane.b32.xlu1 %v2318_v2, %s2216_s9 }
  0x26   : > { %614 = vrot.lane.b32.xlu0 %v2321_v3, %s2216_s9 }
  0x28   : > { %781 = vrot.lane.b32.xlu1 %v2321_v3, %s2218_s13 }
  0x2a   : > { %779 = vrot.lane.b32.xlu0 %v2318_v2, %s2218_s13 }
  0x2c   : > { %300 = vrot.lane.b32.xlu1 %v286_v4, %s2215_s8  ;;  %s2057_s8 = smul.u32 24, %s254_s7 }
  0x2e   : > { %777 = vrot.lane.b32.xlu0 %v2313_v1, %s2218_s13 }
  0x30   : > { %948 = vrot.lane.b32.xlu1 %v2321_v3, %s2219_s14 }
  0x32   : > { %946 = vrot.lane.b32.xlu0 %v2318_v2, %s2219_s14 }
  0x34   : > { %616 = vrot.lane.b32.xlu1 %v286_v4, %s2216_s9  ;;  %s256_s9 = scalar_lea.vmem [#allocation2], %s2057_s8 }
  0x35   : > { %s1821_s11 = sshll.u32 %s256_s9, 4  ;;  %s2488_s11 = int_to_ptr.vmem [resolvable:$true] %s1821_s11 }
  0x36   : > { %944 = vrot.lane.b32.xlu0 %v2313_v1, %s2219_s14 }
  0x38   : > { %1115 = vrot.lane.b32.xlu1 %v2321_v3, %s2220_s21 }
  0x3a   : > { %1113 = vrot.lane.b32.xlu0 %v2318_v2, %s2220_s21 }
  0x3c   : > { %783 = vrot.lane.b32.xlu1 %v286_v4, %s2218_s13 }
  0x3e   : > { %1111 = vrot.lane.b32.xlu0 %v2313_v1, %s2220_s21 }
  0x40   : > { %1280 = vrot.lane.b32.xlu1 %v2318_v2, %s2221_s22 }
  0x42   : > { %950 = vrot.lane.b32.xlu0 %v286_v4, %s2219_s14  ;;  %s2486_s14 = scalar_lea.hbm %s2537_s4, %s2059_s10 }
  0x44   : > { %1278 = vrot.lane.b32.xlu1 %v2313_v1, %s2221_s22 }
  0x46   : > { %1282 = vrot.lane.b32.xlu0 %v2321_v3, %s2221_s22 }
  0x48   : > { %1284 = vrot.lane.b32.xlu1 %v286_v4, %s2221_s22  ;;  %s2225_s22 = smov [#allocation2]  }
  0x4a   : > { %1117 = vrot.lane.b32.xlu0 %v286_v4, %s2220_s21  ;;  %s2134_s21 = scalar_lea.vmem %s2488_s11, 384 }
  0x4b   : > { %p2135_p12 = scmp.ne.s32.totalorder %s2488_s11, %s2134_s21 }
  0x4c   : > { %1449 = vrot.lane.b32.xlu1 %v2321_v3, %s2222_s24 }
  0x4d   : > { %p2136_p13 = pnand %p2135_p12, %p2291_p4 }
  0x4e   : > { %1447 = vrot.lane.b32.xlu0 %v2318_v2, %s2222_s24 }
  0x4f   : > { %p2137_p0 = pneg %p2136_p13 }
  0x50   : > { %1451 = vrot.lane.b32.xlu1 %v286_v4, %s2222_s24 }
  0x52   : > { %1445 = vrot.lane.b32.xlu0 %v2313_v1, %s2222_s24  ;;  %s2138_s24 = sshll.u32 %s2225_s22, 4  ;;  %s2139_s24 = int_to_ptr.vmem [resolvable:$false] %s2138_s24 }
  0x53   : > { %p2141_p1 = scmp.lt.s32.totalorder %s2488_s11, %s2139_s24 }
  0x54   : > { %1616 = vrot.lane.b32.xlu1 %v2321_v3, %s2223_s26 }
  0x56   : > { %1614 = vrot.lane.b32.xlu0 %v2318_v2, %s2223_s26 }
  0x58   : > { %1612 = vrot.lane.b32.xlu1 %v2313_v1, %s2223_s26 }
  0x5a   : > { %1618 = vrot.lane.b32.xlu0 %v286_v4, %s2223_s26  ;;  %s2140_s26 = scalar_lea.vmem %s2139_s24, 768 }
  0x5b   : > { %p2142_p2 = scmp.lt.s32.totalorder %s2140_s26, %s2134_s21 }
  0x5d   : > { %p2143_p3 = por %p2142_p2, %p2141_p1 }
  0x5e   : > { %1780 = vperm.xlu0 %2126, %v1777_v6   ;;  %v1969_v6 = vld [vmem:[%s2535_s2 + $0x40] sm:$0xff] }
  0x5f   : > { %p2144_p5 = pnand %p2143_p3, %p2137_p0 }
  0x8e   : > { %v295_v7 = vpop.permute.xlu1 %294 }
  0x90   : > { %v297_v8 = vpop.permute.xlu0 %296 }
  0x91   : > { %v303_v14 = vsel %vm302_vm1, %v295_v7, %v297_v8 }
  0x92   : > { %v611_v9 = vpop.permute.xlu1 %610 }
  0x94   : > { %v299_v10 = vpop.permute.xlu0 %298 }
  0x95   : > { %v304_v11 = vsel %vm302_vm1, %v297_v8, %v299_v10 }
  0x96   : > { %v613_v13 = vpop.permute.xlu1 %612  ;;  %1923 = vmatprep.subr.msk.mxu0 %vm310_vm2, %v304_v11 }
  0x97   : > { %1924 = vmatpush1.msk.msra.mxu0 %vm310_vm2, %v303_v14  ;;  %v619_v20 = vsel %vm618_vm4, %v611_v9, %v613_v13 }
  0x98   : > { %1925 = vmatmul.mubr.msk.f32.vlgmr.msra.gmra.mrb[0].mxu0 %vm306_vm3, %v1922_v12  ;;  %1928 = vmatprep.subr.msk.mxu0 %vm310_vm2, %v2318_v2  ;;  %v615_v15 = vpop.permute.xlu0 %614 }
  0x99   : > { %v620_v16 = vsel %vm618_vm4, %v613_v13, %v615_v15  ;;  %1929 = vmatpush1.msk.msra.mxu0 %vm310_vm2, %v2313_v1  ;;  %531 = vmatprep.mubr.f32.mxu0 %v2214_v0 }
  0x9a   : > { %v782_v17 = vpop.permute.xlu1 %781  ;;  %1934 = vmatprep.subr.msk.mxu0 %vm310_vm2, %v620_v16 }
  0x9c   : > { %v780_v18 = vpop.permute.xlu0 %779 }
  0x9d   : > { %v787_v22 = vsel %vm785_vm5, %v780_v18, %v782_v17 }
  0x9e   : > { %v301_v21 = vpop.permute.xlu1 %300 }
  0x9f   : > { %v305_v23 = vsel %vm302_vm1, %v299_v10, %v301_v21 }
  0xa0   : > { %1997 = vmatpush3.msk.msra.mxu1 %vm310_vm2, %v305_v23  ;;  %1930 = vmatmul.mubr.msk.f32.vlgmr.msra.gmra.mrb[0].mxu0 %vm306_vm3, %v290_v19  ;;  %v778_v24 = vpop.permute.xlu0 %777 }
  0xa1   : > { %1935 = vmatpush1.msk.msra.mxu0 %vm310_vm2, %v619_v20  ;;  %1999 = vmatmul.mubr.msk.f32.vlgmr.msra.gmra.mrb[0].mxu1 %vm306_vm3, %v1922_v12  ;;  %v786_v31 = vsel %vm785_vm5, %v778_v24, %v780_v18 }
  0xa2   : > { %1940 = vmatprep.subr.msk.mxu0 %vm310_vm2, %v787_v22  ;;  %v949_v25 = vpop.permute.xlu1 %948  ;;  %2001 = vmatprep.subr.mxu1 %v2214_v0 }
  0xa3   : > { %2002 = vmatpush3.msk.msra.mxu1 %vm310_vm2, %v2321_v3  ;;  %2003 = vmatprep.mubr.msk.f32.mxu1 %vm2217_vm0, %v2214_v0 }
  0xa4   : > { %v947_v26 = vpop.permute.xlu0 %946  ;;  %695 = vmatprep.mubr.f32.mxu0 %v2214_v0  ;;  %2006 = vmatprep.subr.mxu1 %v2214_v0 }
  0xa5   : > { %2004 = vmatmul.mubr.msk.f32.vlgmr.msra.gmra.mrb[2].mxu1 %vm306_vm3, %v290_v19  ;;  %v954_v29 = vsel %vm952_vm6, %v947_v26, %v949_v25 }
  0xa6   : > { %v617_v28 = vpop.permute.xlu1 %616  ;;  %2008 = vmatprep.mubr.msk.f32.mxu1 %vm2217_vm0, %v2214_v0 }
  0xa7   : > { %v621_v30 = vsel %vm618_vm4, %v615_v15, %v617_v28 }
  0xa8   : > { %1936 = vmatmul.mubr.msk.f32.vlgmr.msra.gmra.mrb[0].mxu0 %vm306_vm3, %v1933_v27  ;;  %2007 = vmatpush3.msk.msra.mxu1 %vm310_vm2, %v621_v30  ;;  %v945_v32 = vpop.permute.xlu0 %944 }
  0xa9   : > { %1941 = vmatpush1.msk.msra.mxu0 %vm310_vm2, %v786_v31  ;;  %862 = vmatprep.mubr.f32.mxu0 %v2214_v0  ;;  %v953_v39 = vsel %vm952_vm6, %v945_v32, %v947_v26 }
  0xaa   : > { %1946 = vmatprep.subr.msk.mxu0 %vm310_vm2, %v954_v29  ;;  %v1116_v33 = vpop.permute.xlu1 %1115  ;;  %2011 = vmatprep.subr.mxu1 %v2214_v0 }
  0xab   : > { %2009 = vmatmul.mubr.msk.f32.vlgmr.msra.gmra.mrb[4].mxu1 %vm306_vm3, %v1933_v27 }
  0xac   : > { %v1114_v34 = vpop.permute.xlu0 %1113  ;;  %2013 = vmatprep.mubr.msk.f32.mxu1 %vm2217_vm0, %v2214_v0 }
  0xad   : > { %v1121_v37 = vsel %vm1119_vm7, %v1114_v34, %v1116_v33 }
  0xae   : > { %v784_v36 = vpop.permute.xlu1 %783 }
  0xaf   : > { %v788_v38 = vsel %vm785_vm5, %v782_v17, %v784_v36 }
  0xb0   : > { %1942 = vmatmul.mubr.msk.f32.vlgmr.msra.gmra.mrb[0].mxu0 %vm306_vm3, %v1939_v35  ;;  %2012 = vmatpush3.msk.msra.mxu1 %vm310_vm2, %v788_v38  ;;  %v1112_v40 = vpop.permute.xlu0 %1111 }
  0xb1   : > { %1947 = vmatpush1.msk.msra.mxu0 %vm310_vm2, %v953_v39  ;;  %2016 = vmatprep.subr.mxu1 %v2214_v0  ;;  %v1120_v46 = vsel %vm1119_vm7, %v1112_v40, %v1114_v34 }
  0xb2   : > { %1952 = vmatprep.subr.msk.mxu0 %vm310_vm2, %v1121_v37  ;;  %v1281_v41 = vpop.permute.xlu1 %1280  ;;  %2014 = vmatmul.mubr.msk.f32.vlgmr.msra.gmra.mrb[6].mxu1 %vm306_vm3, %v1939_v35 }
  0xb3   : > { %1029 = vmatprep.mubr.f32.mxu0 %v2214_v0  ;;  %2018 = vmatprep.mubr.msk.f32.mxu1 %vm2217_vm0, %v2214_v0 }
  0xb4   : > { %v951_v42 = vpop.permute.xlu0 %950 }
  0xb5   : > { %v955_v43 = vsel %vm952_vm6, %v949_v25, %v951_v42 }
  0xb6   : > { %2017 = vmatpush3.msk.msra.mxu1 %vm310_vm2, %v955_v43  ;;  %v1279_v45 = vpop.permute.xlu1 %1278 }
  0xb7   : > { %2019 = vmatmul.mubr.msk.f32.vlgmr.msra.gmra.mrb[8].mxu1 %vm306_vm3, %v1945_v44  ;;  %2021 = vmatprep.subr.mxu1 %v2214_v0  ;;  %v1287_v54 = vsel %vm1286_vm8, %v1279_v45, %v1281_v41 }
  0xb8   : > { %1948 = vmatmul.mubr.msk.f32.vlgmr.msra.gmra.mrb[0].mxu0 %vm306_vm3, %v1945_v44  ;;  %v1283_v47 = vpop.permute.xlu0 %1282  ;;  %2023 = vmatprep.mubr.msk.f32.mxu1 %vm2217_vm0, %v2214_v0 }
  0xb9   : > { %1953 = vmatpush1.msk.msra.mxu0 %vm310_vm2, %v1120_v46  ;;  %v1288_v48 = vsel %vm1286_vm8, %v1281_v41, %v1283_v47  ;;  %1196 = vmatprep.mubr.f32.mxu0 %v2214_v0 }
  0xba   : > { %1958 = vmatprep.subr.msk.mxu0 %vm310_vm2, %v1288_v48  ;;  %v1285_v49 = vpop.permute.xlu1 %1284 }
  0xbb   : > { %v1289_v52 = vsel %vm1286_vm8, %v1283_v47, %v1285_v49 }
  0xbc   : > { %v1118_v50 = vpop.permute.xlu0 %1117 }
  0xbd   : > { %v1122_v53 = vsel %vm1119_vm7, %v1116_v33, %v1118_v50 }
  0xbe   : > { %2022 = vmatpush3.msk.msra.mxu1 %vm310_vm2, %v1122_v53  ;;  %v1450_v55 = vpop.permute.xlu1 %1449 }
  0xbf   : > { %2024 = vmatmul.mubr.msk.f32.vlgmr.msra.gmra.mrb[10].mxu1 %vm306_vm3, %v1951_v51  ;;  %2026 = vmatprep.subr.mxu1 %v2214_v0 }
  0xc0   : > { %1954 = vmatmul.mubr.msk.f32.vlgmr.msra.gmra.mrb[0].mxu0 %vm306_vm3, %v1951_v51  ;;  %2027 = vmatpush3.msk.msra.mxu1 %vm310_vm2, %v1289_v52  ;;  %v1448_v56 = vpop.permute.xlu0 %1447 }
  0xc1   : > { %1959 = vmatpush1.msk.msra.mxu0 %vm310_vm2, %v1287_v54  ;;  %v1455_v58 = vsel %vm1453_vm9, %v1448_v56, %v1450_v55  ;;  %2028 = vmatprep.mubr.msk.f32.mxu1 %vm2217_vm0, %v2214_v0 }
  0xc2   : > { %v1452_v59 = vpop.permute.xlu1 %1451  ;;  %2031 = vmatprep.subr.mxu1 %v2214_v0  ;;  %1964 = vmatprep.subr.msk.mxu0 %vm310_vm2, %v1455_v58 }
  0xc3   : > { %v1456_v60 = vsel %vm1453_vm9, %v1450_v55, %v1452_v59  ;;  %2029 = vmatmul.mubr.msk.f32.vlgmr.msra.gmra.mrb[12].mxu1 %vm306_vm3, %v1957_v57  ;;  %1363 = vmatprep.mubr.f32.mxu0 %v2214_v0 }
  0xc4   : > { %v1446_v61 = vpop.permute.xlu0 %1445  ;;  %2032 = vmatpush3.msk.msra.mxu1 %vm310_vm2, %v1456_v60  ;;  %2033 = vmatprep.mubr.msk.f32.mxu1 %vm2217_vm0, %v2214_v0 }
  0xc5   : > { %2036 = vmatprep.subr.mxu1 %v2214_v0  ;;  %v1454_v63 = vsel %vm1453_vm9, %v1446_v61, %v1448_v56 }
  0xc6   : > { %v1617_v1 = vpop.permute.xlu1 %1616 }
  0xc7   : > { %2034 = vmatmul.mubr.msk.f32.vlgmr.msra.gmra.mrb[14].mxu1 %vm306_vm3, %v1963_v62 }
  0xc8   : > { %1960 = vmatmul.mubr.msk.f32.vlgmr.msra.gmra.mrb[0].mxu0 %vm306_vm3, %v1957_v57  ;;  %v1615_v2 = vpop.permute.xlu0 %1614  ;;  %2038 = vmatprep.mubr.msk.f32.mxu1 %vm2217_vm0, %v2214_v0 }
  0xc9   : > { %1965 = vmatpush1.msk.msra.mxu0 %vm310_vm2, %v1454_v63  ;;  %v1622_v3 = vsel %vm1620_vm10, %v1615_v2, %v1617_v1  ;;  %1530 = vmatprep.mubr.f32.mxu0 %v2214_v0 }
  0xca   : > { %1970 = vmatprep.subr.msk.mxu0 %vm310_vm2, %v1622_v3  ;;  %v1613_v4 = vpop.permute.xlu1 %1612 }
  0xcb   : > { %v1621_v8 = vsel %vm1620_vm10, %v1613_v4, %v1615_v2 }
  0xcc   : > { %v1619_v5 = vpop.permute.xlu0 %1618 }
  0xcd   : > { %v1623_v7 = vsel %vm1620_vm10, %v1617_v1, %v1619_v5 }
  0xce   : > { %2037 = vmatpush3.msk.msra.mxu1 %vm310_vm2, %v1623_v7 }
  0xcf   : > { %2039 = vmatmul.mubr.msk.f32.vlgmr.msra.gmra.mrb[16].mxu1 %vm306_vm3, %v1969_v6 }
  0xd0   : > { %1966 = vmatmul.mubr.msk.f32.vlgmr.msra.gmra.mrb[0].mxu0 %vm306_vm3, %v1963_v62 }
  0xd1   : > { %1971 = vmatpush1.msk.msra.mxu0 %vm310_vm2, %v1621_v8  ;;  %1697 = vmatprep.mubr.f32.mxu0 %v2214_v0 }
  0xd8   : > { %1972 = vmatmul.mubr.msk.f32.vlgmr.msra.gmra.mrb[0].mxu0 %vm306_vm3, %v1969_v6 }
  0xdd   : > { %v1781_v32 = vpop.permute.xlu0 %1780 }
 0x174   : > { %v454_v9 = vpop.f32.mrb[0].mxu1 }
 0x175   : > { %v2000_v10 = vpop.f32.mrb[1].mxu1 }
 0x178   : > { %v604_v11 = vpop.f32.mrb[2].mxu1 }
 0x179   : > { %v605_v12 = vadd.f32 %v604_v11, %v454_v9  ;;  %v2005_v13 = vpop.f32.mrb[3].mxu1 }
 0x17e   : > { %v768_v14 = vpop.f32.mrb[4].mxu1 }
 0x17f   : > { %v774_v15 = vadd.f32 %v768_v14, %v605_v12  ;;  %v2010_v16 = vpop.f32.mrb[5].mxu1 }
 0x185   : > { %v935_v17 = vpop.f32.mrb[6].mxu1 }
 0x186   : > { %v941_v18 = vadd.f32 %v935_v17, %v774_v15  ;;  %v2015_v19 = vpop.f32.mrb[7].mxu1 }
 0x18a   : > { %v1102_v20 = vpop.f32.mrb[8].mxu1 }
 0x18b   : > { %v1108_v21 = vadd.f32 %v1102_v20, %v941_v18  ;;  %v2020_v22 = vpop.f32.mrb[9].mxu1 }
 0x192   : > { %v1269_v23 = vpop.f32.mrb[10].mxu1 }
 0x193   : > { %v1275_v24 = vadd.f32 %v1269_v23, %v1108_v21  ;;  %v2025_v25 = vpop.f32.mrb[11].mxu1 }
 0x196   : > { %v1436_v0 = vpop.f32.mrb[12].mxu1 }
 0x197   : > { %v1442_v26 = vadd.f32 %v1436_v0, %v1275_v24  ;;  %v2030_v27 = vpop.f32.mrb[13].mxu1 }
 0x19a   : > { %v1603_v28 = vpop.f32.mrb[14].mxu1 }
 0x19b   : > { %v1609_v29 = vadd.f32 %v1603_v28, %v1442_v26  ;;  %v2035_v30 = vpop.f32.mrb[15].mxu1 }
 0x1a2   : > { %v1770_v31 = vpop.f32.mrb[16].mxu1 }
 0x1a3   : > { %v1776_v33 = vadd.f32 %v1770_v31, %v1609_v29  ;;  %v2040_v34 = vpop.f32.mrb[17].mxu1 }
 0x1a5   : > { %v1785_v35 = vadd.f32 %v1781_v32, %v1776_v33 }
 0x1a7   : > { %v1791_v36 = vmul.f32 0.70710677, %v1785_v35  ;;  %v1788_v44 = vmul.f32 0.5, %v1785_v35 }
 0x1a9   : > { %2128 = verf.f32 %v1791_v36 }
 0x1ab   : > { %v1699_v37 = vpop.f32.mrb[0].mxu0 }
 0x1ac   : > { %v1783_v38 = vadd.f32 %v1781_v32, %v1699_v37  ;;  %v1701_v39 = vpop.f32.mrb[1].mxu0 }
 0x1ad   : > { %v1784_v40 = vadd.f32 %v1781_v32, %v1701_v39 }
 0x1ae   : > { %v1789_v41 = vmul.f32 0.70710677, %v1783_v38  ;;  %v1786_v49 = vmul.f32 0.5, %v1783_v38 }
 0x1af   : > { %v1790_v42 = vmul.f32 0.70710677, %v1784_v40  ;;  %v1787_v51 = vmul.f32 0.5, %v1784_v40 }
 0x1b0   : > { %2130 = verf.f32 %v1789_v41 }
 0x1b1   : > { %2132 = verf.f32 %v1790_v42 }
 0x1b3   : > { %v2129_v43 = vpop.eup %2128 }
 0x1b4   : > { %v1797_v45 = vadd.f32 1.0, %v2129_v43 }
 0x1b6   : > { %v1800_v46 = vmul.f32 %v1797_v45, %v1788_v44 }
 0x1b8   : > { %1803 = vst [vmem:[%s256_s9 + $0x10] sm:$0xff] %v1800_v46 }
 0x1ba   : > { %v2131_v47 = vpop.eup %2130 }
 0x1bb   : > { %v2133_v48 = vpop.eup %2132  ;;  %v1795_v50 = vadd.f32 1.0, %v2131_v47 }
 0x1bc   : > { %v1796_v52 = vadd.f32 1.0, %v2133_v48 }
 0x1bd   : > { %v1798_v53 = vmul.f32 %v1795_v50, %v1786_v49 }
 0x1be   : > { %v1799_v54 = vmul.f32 %v1796_v52, %v1787_v51 }
 0x1bf   : > { %1801 = vst [vmem:[%s256_s9] sm:$0xff] %v1798_v53 }
 0x1c0   : > { %1802 = vst [vmem:[%s256_s9 + $0x8] sm:$0xff] %v1799_v54 }
 0x1c1   : > { %2147 = shalt.err (!%p2144_p5)
}
 0x1c2   : > { %s2148_s29 = scalar_lea.hbm %s2486_s14, 384  ;;  %s2152_s6 = scalar_lea.hbm %s2537_s4, 768 }
 0x1c3   : > { %p2149_p6 = scmp.ne.s32.totalorder %s2486_s14, %s2148_s29  ;;  %p2153_p10 = scmp.lt.u32.totalorder %s2486_s14, %s2537_s4 }
 0x1c4   : > { %p2154_p11 = scmp.lt.u32.totalorder %s2152_s6, %s2148_s29  ;;  %p2156_p13 = scmp.lt.u32.totalorder %s2148_s29, %s2486_s14 }
 0x1c5   : > { %p2150_p7 = pnand %p2149_p6, %p2291_p4 }
 0x1c6   : > { %p2155_p12 = por %p2154_p11, %p2153_p10 }
 0x1c7   : > { %p2151_p9 = pneg %p2150_p7 }
 0x1c8   : > { %p2157_p0 = por %p2156_p13, %p2155_p12 }
 0x1ca   : > { %p2158_p1 = pnand %p2157_p0, %p2151_p9 }
 0x1cc   : > { %2161 = shalt.err (!%p2158_p1)
}
 0x1cd   : > { %2060 = dma.vmem_to_hbm [thread:$0]  (%p2291_p4), %s2488_s11, 384, %s2486_s14, %s1805_s18  }
 0x1ce PF: > { %p2066_p2 = scmp.ge.s32.totalorder %s2212_s20, 2  ;;  %s1833_s9 = sand.u32 1, %s2192_s15  }
 0x1cf   : > { %s1834_s10 = scalar_lea.sflag [#allocation3], %s1833_s9 }
 0x1d0   : > { %p2063_p3 = pnand %p2066_p2, %p2298_p8 }
 0x1d2   : > { %2187 = dma.done.wait (!%p2063_p3), %s1834_s10, 384  }
 0x1d3   : > { %2189 = vsyncadd (!%p2063_p3), %s1834_s10, 4294966912  ;;  %s17_s20 = sadd.s32 1, %s2212_s20   ;;  %s2540_s15 = smov %s2196_s16 }
 0x1d4   : > { %p14_p5 = scmp.ge.s32.totalorder %s17_s20, 4   ;;  %s2541_s16 = smov %s2200_s17 }
 0x1d5   : > { %s2542_s17 = smov %s2304_s28  ;;  %s2543_s18 = smov %s2208_s19 }
 0x1d6   : > { %s2544_s19 = smov %s2546_s23  ;;  %16 = sbr.rel (!%p14_p5) target bundleno = 4 (0x4), region = 82 }
 0x1dd   :  { %1839 = vsyncpa [#allocation3], 1 }
 0x1de   :  { %1841 = vsyncpa [#allocation3 + $0x1], 1 }

</bundles_post_ra>
